<compile_context>
chip_gen: v7x
topology: tpu7x:2x2x1
jax: 0.10.0
libtpu: 0.0.40
codegen_flags: <defaults>
</compile_context>

<pallas_src>
import functools

import jax
import jax.numpy as jnp
from jax.experimental import pallas as pl
from jax.experimental.pallas import tpu as pltpu

HIDDEN = 64
HEAD_LANES = 128       # packed head-output width (lane-dense, >= 2*A + 1)
_TB_CAP = 1024         # max batch-tile rows (VMEM: ~1 MiB double-buffered out)


# -----------------------------------------------------------------------------
# Kernel
# -----------------------------------------------------------------------------
def _pi_v_fc_kernel(x_ref, w1_ref, w2_ref, wh_ref, b12_ref, bh_ref,
                    out_ref, *, action_size, head_dtype):
    # In-kernel f32 -> bf16 cast of the input (cheap VPU op, hidden under MXU).
    x = x_ref[...].astype(jnp.bfloat16)               # [TB, S]
    b12 = b12_ref[...]                                # [2, HIDDEN] f32

    # y1 = relu(fc1(x))
    y1 = jnp.dot(x, w1_ref[...], preferred_element_type=jnp.float32)
    y1 = jnp.maximum(y1 + b12[0:1, :], 0.0).astype(jnp.bfloat16)

    # y2 = relu(fc2(y1))
    y2 = jnp.dot(y1, w2_ref[...], preferred_element_type=jnp.float32)
    y2 = jnp.maximum(y2 + b12[1:2, :], 0.0).astype(jnp.bfloat16)

    # Fused heads: columns [0:A)=mu, [A:2A)=sigma, [2A:2A+1)=v, rest zero pad
    # (pad columns of wh/bh are exactly zero, so pad lanes of h are zero).
    h = jnp.dot(y2, wh_ref[...], preferred_element_type=jnp.float32) + bh_ref[...]
    h = h.astype(head_dtype)                          # bf16 on v6e/v7x, f32 on v5e

    col = jax.lax.broadcasted_iota(jnp.int32, h.shape, dimension=1)
    mu = jnp.tanh(h)
    sigma = jnp.maximum(jnp.logaddexp(h, 0.0), 1e-10)   # stable softplus + clamp
    packed = jnp.where(col < action_size, mu,
                       jnp.where(col < 2 * action_size, sigma, h))
    out_ref[...] = packed.astype(out_ref.dtype)          # one unmasked 128-lane store


# -----------------------------------------------------------------------------
# Parameter packing (do once, outside the hot path)
# -----------------------------------------------------------------------------
def pack_params(params):
    """Pack PyTorch-layout params into matmul-friendly slabs."""
    wh = jnp.concatenate([params["wmu"], params["wsig"], params["wv"]], axis=1)
    bh = jnp.concatenate([params["bmu"], params["bsig"], params["bv"]], axis=1)
    assert wh.shape[1] <= HEAD_LANES, (
        f"2*action_size + 1 = {wh.shape[1]} exceeds packed head width "
        f"{HEAD_LANES}; increase HEAD_LANES.")
    pad = HEAD_LANES - wh.shape[1]
    wh = jnp.pad(wh, ((0, 0), (0, pad)))               # zero pad -> pad lanes stay 0
    bh = jnp.pad(bh, ((0, 0), (0, pad)))
    b12 = jnp.concatenate([params["b1"], params["b2"]], axis=0)      # [2, HIDDEN]
    return dict(
        w1=params["w1"].astype(jnp.bfloat16),
        w2=params["w2"].astype(jnp.bfloat16),
        wh=wh.astype(jnp.bfloat16),
        b12=b12.astype(jnp.float32),
        bh=bh.astype(jnp.float32),
    )


# -----------------------------------------------------------------------------
# Device-dependent configuration (trace-time Python only)
# -----------------------------------------------------------------------------
def _device_kind():
    try:
        return jax.devices()[0].device_kind.lower()
    except Exception:
        return ""


def _num_tensorcores():
    # v7x has 2 TensorCores per chip; v5e/v6e have 1.
    return 2 if "v7" in _device_kind() else 1


def _use_bf16_heads():
    # bf16 VPU/EUP path exists on v6e/v7x only; keep f32 elsewhere (v5e etc.).
    kind = _device_kind()
    return ("v6" in kind) or ("v7" in kind)


def _round_up(n, m):
    return -(-n // m) * m


def _batch_tile(batch, num_cores):
    """Fixed large tile + cdiv grid; split across cores on v7x."""
    if num_cores > 1 and batch >= 16:
        tb = _round_up(pl.cdiv(batch, num_cores), 8)
    else:
        tb = batch
    tb = min(tb, _TB_CAP)
    if tb >= batch:
        return batch                      # single full-extent block (always legal)
    return _round_up(tb, 8)               # partial last block; tile must be 8-aligned


# -----------------------------------------------------------------------------
# Forward
# -----------------------------------------------------------------------------
@functools.partial(jax.jit,
                   static_argnames=("action_size", "block_batch", "bf16_heads"))
def _pi_v_fc_call(x, w1, w2, wh, b12, bh, *, action_size, block_batch, bf16_heads):
    B, S = x.shape
    A = action_size
    TB = block_batch
    head_dtype = jnp.bfloat16 if bf16_heads else jnp.float32

    kernel = functools.partial(_pi_v_fc_kernel,
                               action_size=A, head_dtype=head_dtype)

    out = pl.pallas_call(
        kernel,
        out_shape=jax.ShapeDtypeStruct((B, HEAD_LANES), jnp.float32),
        grid_spec=pltpu.PrefetchScalarGridSpec(
            num_scalar_prefetch=0,
            grid=(pl.cdiv(B, TB),),
            in_specs=[
                pl.BlockSpec((TB, S), lambda i: (i, 0)),              # x (batch-tiled)
                pl.BlockSpec((S, HIDDEN), lambda i: (0, 0)),          # w1 (resident)
                pl.BlockSpec((HIDDEN, HIDDEN), lambda i: (0, 0)),     # w2 (resident)
                pl.BlockSpec((HIDDEN, HEAD_LANES), lambda i: (0, 0)), # fused head W
                pl.BlockSpec((2, HIDDEN), lambda i: (0, 0)),          # b1 ; b2
                pl.BlockSpec((1, HEAD_LANES), lambda i: (0, 0)),      # fused head bias
            ],
            out_specs=pl.BlockSpec((TB, HEAD_LANES), lambda i: (i, 0)),
        ),
        compiler_params=pltpu.CompilerParams(
            dimension_semantics=("parallel",)),
    )(x, w1, w2, wh, b12, bh)

    mu = out[:, :A]
    sigma = out[:, A:2 * A]
    values = out[:, 2 * A]                # matches torch .view(-1); relies on
    #                                       zero-padded wh/bh pad columns.
    return mu, sigma, values


def pi_v_fc_forward(x, packed, *, action_size):
    """x: [B, state_size] f32. Returns (mu [B,A], sigma [B,A], values [B])."""
    TB = _batch_tile(x.shape[0], _num_tensorcores())
    # TODO(synk): torch.distributions.Normal has no Pallas equivalent; we
    # return its parameters (mu, sigma) instead of a distribution object.
    return _pi_v_fc_call(x, packed["w1"], packed["w2"], packed["wh"],
                         packed["b12"], packed["bh"],
                         action_size=action_size, block_batch=TB,
                         bf16_heads=_use_bf16_heads())


# -----------------------------------------------------------------------------
# Init + reference + test
# -----------------------------------------------------------------------------
def init_params(key, state_size, action_size):
    """Deterministic PyTorch-style (uniform fan-in) init, stored as [in, out]."""
    def linear(k, fan_in, fan_out):
        kw, kb = jax.random.split(k)
        bound = 1.0 / jnp.sqrt(fan_in)
        w = jax.random.uniform(kw, (fan_in, fan_out), jnp.float32, -bound, bound)
        b = jax.random.uniform(kb, (1, fan_out), jnp.float32, -bound, bound)
        return w, b

    k1, k2, k3, k4, k5 = jax.random.split(key, 5)
    w1, b1 = linear(k1, state_size, HIDDEN)
    w2, b2 = linear(k2, HIDDEN, HIDDEN)
    wmu, bmu = linear(k3, HIDDEN, action_size)
    wsig, bsig = linear(k4, HIDDEN, action_size)
    wv, bv = linear(k5, HIDDEN, 1)
    return dict(w1=w1, b1=b1, w2=w2, b2=b2,
                wmu=wmu, bmu=bmu, wsig=wsig, bsig=bsig,
                wv=wv, bv=bv)


def _reference(x, params):
    """Pure-JAX f32 reference matching the PyTorch forward semantics."""
    y1 = jnp.maximum(x @ params["w1"] + params["b1"], 0.0)
    y2 = jnp.maximum(y1 @ params["w2"] + params["b2"], 0.0)
    mu = jnp.tanh(y2 @ params["wmu"] + params["bmu"])
    sigma = jnp.maximum(jax.nn.softplus(y2 @ params["wsig"] + params["bsig"]), 1e-10)
    values = (y2 @ params["wv"] + params["bv"]).reshape(-1)
    return mu, sigma, values


if __name__ == "__main__":
    key = jax.random.PRNGKey(0)
    k_x, k_p = jax.random.split(key)

    batch = 8
    state_size = 32
    action_size = 4

    x = jax.random.normal(k_x, (batch, state_size), jnp.float32)
    params = init_params(k_p, state_size, action_size)
    packed = pack_params(params)

    mu, sigma, values = pi_v_fc_forward(x, packed, action_size=action_size)
    jax.block_until_ready((mu, sigma, values))

    assert mu.shape == (batch, action_size)
    assert sigma.shape == (batch, action_size)
    assert values.shape == (batch,)
    assert bool(jnp.all(sigma >= 1e-10))
    assert bool(jnp.all(jnp.abs(mu) <= 1.0))

    # bf16 matmul operands (f32 accumulation) + optional bf16 head activations
    # -> small deviation vs the f32 reference.
    mu_ref, sigma_ref, values_ref = _reference(x, params)
    assert bool(jnp.allclose(mu, mu_ref, atol=3e-2, rtol=3e-2))
    assert bool(jnp.allclose(sigma, sigma_ref, atol=3e-2, rtol=3e-2))
    assert bool(jnp.allclose(values, values_ref, atol=3e-2, rtol=3e-2))

    print("KERNEL_OK")
</pallas_src>

<mosaic_0001>
module attributes {stable_mosaic.version = 11 : i64} {
  func.func @_pi_v_fc_kernel(%arg0: i32, %arg1: memref<8x32xf32, #tpu.memory_space<vmem>>, %arg2: memref<32x64xbf16, #tpu.memory_space<vmem>>, %arg3: memref<64x64xbf16, #tpu.memory_space<vmem>>, %arg4: memref<64x128xbf16, #tpu.memory_space<vmem>>, %arg5: memref<2x64xf32, #tpu.memory_space<vmem>>, %arg6: memref<1x128xf32, #tpu.memory_space<vmem>>, %arg7: memref<8x128xf32, #tpu.memory_space<vmem>>) attributes {dimension_semantics = [#tpu.dimension_semantics<parallel>], iteration_bounds = array<i64: 1>, scalar_prefetch = 0 : i64, scratch_operands = 0 : i64, tpu.core_type = #tpu.core_type<tc>, window_params = [{transform_indices = @transform_0, window_bounds = array<i64: 8, 32>}, {pipeline_mode = #tpu.pipeline_mode<synchronous>, transform_indices = @transform_1, window_bounds = array<i64: 32, 64>}, {pipeline_mode = #tpu.pipeline_mode<synchronous>, transform_indices = @transform_2, window_bounds = array<i64: 64, 64>}, {pipeline_mode = #tpu.pipeline_mode<synchronous>, transform_indices = @transform_3, window_bounds = array<i64: 64, 128>}, {pipeline_mode = #tpu.pipeline_mode<synchronous>, transform_indices = @transform_4, window_bounds = array<i64: 2, 64>}, {pipeline_mode = #tpu.pipeline_mode<synchronous>, transform_indices = @transform_5, window_bounds = array<i64: 1, 128>}, {transform_indices = @transform_6, window_bounds = array<i64: 8, 128>}]} {
    %c0 = arith.constant 0 : index
    %c0_0 = arith.constant 0 : index
    %0 = vector.load %arg1[%c0, %c0_0] : memref<8x32xf32, #tpu.memory_space<vmem>>, vector<8x32xf32>
    %1 = arith.truncf %0 : vector<8x32xf32> to vector<8x32xbf16>
    %c0_1 = arith.constant 0 : index
    %c0_2 = arith.constant 0 : index
    %2 = vector.load %arg5[%c0_1, %c0_2] : memref<2x64xf32, #tpu.memory_space<vmem>>, vector<2x64xf32>
    %c0_3 = arith.constant 0 : index
    %c0_4 = arith.constant 0 : index
    %3 = vector.load %arg2[%c0_3, %c0_4] : memref<32x64xbf16, #tpu.memory_space<vmem>>, vector<32x64xbf16>
    %cst = arith.constant dense<0.000000e+00> : vector<8x64xf32>
    %4 = tpu.matmul %1, %3, %cst {dimension_numbers = #tpu.dot_dimension_numbers<[1], [0], [0], [1], [0, 0, 1, 1], [], []>} : vector<8x32xbf16>, vector<32x64xbf16>, vector<8x64xf32> -> vector<8x64xf32>
    %5 = vector.extract_strided_slice %2 {offsets = [0, 0], sizes = [1, 64], strides = [1, 1]} : vector<2x64xf32> to vector<1x64xf32>
    %6 = vector.broadcast %5 : vector<1x64xf32> to vector<8x64xf32>
    %7 = arith.addf %4, %6 : vector<8x64xf32>
    %cst_5 = arith.constant 0.000000e+00 : f32
    %8 = vector.broadcast %cst_5 : f32 to vector<8x64xf32>
    %9 = arith.maximumf %7, %8 : vector<8x64xf32>
    %10 = arith.truncf %9 : vector<8x64xf32> to vector<8x64xbf16>
    %c0_6 = arith.constant 0 : index
    %c0_7 = arith.constant 0 : index
    %11 = vector.load %arg3[%c0_6, %c0_7] : memref<64x64xbf16, #tpu.memory_space<vmem>>, vector<64x64xbf16>
    %cst_8 = arith.constant dense<0.000000e+00> : vector<8x64xf32>
    %12 = tpu.matmul %10, %11, %cst_8 {dimension_numbers = #tpu.dot_dimension_numbers<[1], [0], [0], [1], [0, 0, 1, 1], [], []>} : vector<8x64xbf16>, vector<64x64xbf16>, vector<8x64xf32> -> vector<8x64xf32>
    %13 = vector.extract_strided_slice %2 {offsets = [1, 0], sizes = [1, 64], strides = [1, 1]} : vector<2x64xf32> to vector<1x64xf32>
    %14 = vector.broadcast %13 : vector<1x64xf32> to vector<8x64xf32>
    %15 = arith.addf %12, %14 : vector<8x64xf32>
    %cst_9 = arith.constant 0.000000e+00 : f32
    %16 = vector.broadcast %cst_9 : f32 to vector<8x64xf32>
    %17 = arith.maximumf %15, %16 : vector<8x64xf32>
    %18 = arith.truncf %17 : vector<8x64xf32> to vector<8x64xbf16>
    %c0_10 = arith.constant 0 : index
    %c0_11 = arith.constant 0 : index
    %19 = vector.load %arg4[%c0_10, %c0_11] : memref<64x128xbf16, #tpu.memory_space<vmem>>, vector<64x128xbf16>
    %cst_12 = arith.constant dense<0.000000e+00> : vector<8x128xf32>
    %20 = tpu.matmul %18, %19, %cst_12 {dimension_numbers = #tpu.dot_dimension_numbers<[1], [0], [0], [1], [0, 0, 1, 1], [], []>} : vector<8x64xbf16>, vector<64x128xbf16>, vector<8x128xf32> -> vector<8x128xf32>
    %c0_13 = arith.constant 0 : index
    %c0_14 = arith.constant 0 : index
    %21 = vector.load %arg6[%c0_13, %c0_14] : memref<1x128xf32, #tpu.memory_space<vmem>>, vector<1x128xf32>
    %22 = vector.broadcast %21 : vector<1x128xf32> to vector<8x128xf32>
    %23 = arith.addf %20, %22 : vector<8x128xf32>
    %24 = tpu.iota {dimensions = array<i32: 1>} : vector<8x128xi32>
    %25 = math.tanh %23 : vector<8x128xf32>
    %cst_15 = arith.constant 0.000000e+00 : f32
    %26 = vector.broadcast %cst_15 : f32 to vector<8x128xf32>
    %27 = arith.maximumf %23, %26 : vector<8x128xf32>
    %28 = vector.broadcast %cst_15 : f32 to vector<8x128xf32>
    %29 = arith.subf %23, %28 : vector<8x128xf32>
    %30 = arith.cmpf one, %29, %29 : vector<8x128xf32>
    %31 = vector.broadcast %cst_15 : f32 to vector<8x128xf32>
    %32 = arith.addf %23, %31 : vector<8x128xf32>
    %33 = math.absf %29 : vector<8x128xf32>
    %cst_16 = arith.constant 0.000000e+00 : f32
    %34 = vector.broadcast %cst_16 : f32 to vector<8x128xf32>
    %35 = arith.subf %34, %33 : vector<8x128xf32>
    %36 = math.exp %35 : vector<8x128xf32>
    %37 = math.log1p %36 : vector<8x128xf32>
    %38 = arith.addf %27, %37 : vector<8x128xf32>
    %39 = arith.select %30, %32, %38 : vector<8x128xi1>, vector<8x128xf32>
    %cst_17 = arith.constant 1.000000e-10 : f32
    %40 = vector.broadcast %cst_17 : f32 to vector<8x128xf32>
    %41 = arith.maximumf %39, %40 : vector<8x128xf32>
    %c4_i32 = arith.constant 4 : i32
    %42 = vector.broadcast %c4_i32 : i32 to vector<8x128xi32>
    %43 = arith.cmpi slt, %24, %42 : vector<8x128xi32>
    %c8_i32 = arith.constant 8 : i32
    %44 = vector.broadcast %c8_i32 : i32 to vector<8x128xi32>
    %45 = arith.cmpi slt, %24, %44 : vector<8x128xi32>
    %46 = arith.select %45, %41, %23 : vector<8x128xi1>, vector<8x128xf32>
    %47 = arith.select %43, %25, %46 : vector<8x128xi1>, vector<8x128xf32>
    %c0_18 = arith.constant 0 : index
    %c0_19 = arith.constant 0 : index
    %48 = vector.load %arg7[%c0_18, %c0_19] : memref<8x128xf32, #tpu.memory_space<vmem>>, vector<8x128xf32>
    tpu.vector_store %arg7[%c0_18, %c0_19], %47 {strides = array<i32>} : memref<8x128xf32, #tpu.memory_space<vmem>>, vector<8x128xf32>,
    return
  }
  func.func @transform_0(%arg0: i32) -> (i32, i32) {
    %c0_i32 = arith.constant 0 : i32
    %c0_i32_0 = arith.constant 0 : i32
    return %arg0, %c0_i32 : i32, i32
  }
  func.func @transform_1(%arg0: i32) -> (i32, i32) {
    %c0_i32 = arith.constant 0 : i32
    %c0_i32_0 = arith.constant 0 : i32
    %c0_i32_1 = arith.constant 0 : i32
    return %c0_i32, %c0_i32_0 : i32, i32
  }
  func.func @transform_2(%arg0: i32) -> (i32, i32) {
    %c0_i32 = arith.constant 0 : i32
    %c0_i32_0 = arith.constant 0 : i32
    %c0_i32_1 = arith.constant 0 : i32
    return %c0_i32, %c0_i32_0 : i32, i32
  }
  func.func @transform_3(%arg0: i32) -> (i32, i32) {
    %c0_i32 = arith.constant 0 : i32
    %c0_i32_0 = arith.constant 0 : i32
    %c0_i32_1 = arith.constant 0 : i32
    return %c0_i32, %c0_i32_0 : i32, i32
  }
  func.func @transform_4(%arg0: i32) -> (i32, i32) {
    %c0_i32 = arith.constant 0 : i32
    %c0_i32_0 = arith.constant 0 : i32
    %c0_i32_1 = arith.constant 0 : i32
    return %c0_i32, %c0_i32_0 : i32, i32
  }
  func.func @transform_5(%arg0: i32) -> (i32, i32) {
    %c0_i32 = arith.constant 0 : i32
    %c0_i32_0 = arith.constant 0 : i32
    %c0_i32_1 = arith.constant 0 : i32
    return %c0_i32, %c0_i32_0 : i32, i32
  }
  func.func @transform_6(%arg0: i32) -> (i32, i32) {
    %c0_i32 = arith.constant 0 : i32
    %c0_i32_0 = arith.constant 0 : i32
    return %arg0, %c0_i32 : i32, i32
  }
}

</mosaic_0001>

<bundles_post_ra>
// kernel: _pi_v_fc_call.1
= control target key start
LH: loop header
LB: loop body
LE: loop exit
PB: predicated region body
PF: predicated region fallthrough
CT: control target
= control target key end

     0   :  { %11 = vsyncpa [#allocation3], 0  ;;  %s635_s0 = inlined_call_operand.hbm [shape: f32[8,32], index: 0, kind: input, shape index: {}]   ;;  %s636_s1 = inlined_call_operand.hbm [shape: bf16[32,64], index: 1, kind: input, shape index: {}]   ;;  %s637_s2 = inlined_call_operand.hbm [shape: bf16[64,64], index: 2, kind: input, shape index: {}]   ;;  %s638_s3 = inlined_call_operand.hbm [shape: bf16[64,128], index: 3, kind: input, shape index: {}]   ;;  %s639_s4 = inlined_call_operand.vmem [shape: f32[2,64], index: 4, kind: input, shape index: {}]   ;;  %s640_s5 = inlined_call_operand.vmem [shape: f32[1,128], index: 5, kind: input, shape index: {}]   ;;  %s641_s6 = inlined_call_operand.vmem [shape: f32[8,128], index: 6, kind: output, shape index: {}]  }
   0x1   :  { %12 = vsyncpa [#allocation5], 0 }
   0x2   :  { %13 = vsyncpa [#allocation8], 0  ;;  %s521_s21 = smov [#allocation4]   ;;  %s427_s25 = scalar_lea.hbm %s636_s1, 256 }
   0x3   :  { %s29_s22 = sshll.u32 %s521_s21, 4  ;;  %p428_p0 = scmp.ne.s32.totalorder %s636_s1, %s427_s25  ;;  %s30_s22 = int_to_ptr.vmem [resolvable:$true] %s29_s22 }
   0x4   :  { %p431_p1 = scmp.lt.u32.totalorder %s427_s25, %s636_s1 }
   0x6   :  { %p433_p2 = pnand %p431_p1, %p428_p0 }
   0x8   :  { %436 = shalt.err (!%p433_p2)
}
   0x9   :  { %s437_s30 = scalar_lea.vmem %s30_s22, 256  ;;  %p442_p4 = scmp.lt.s32.totalorder %s30_s22, %s30_s22 }
   0xa   :  { %p438_p3 = scmp.ne.s32.totalorder %s30_s22, %s437_s30  ;;  %p443_p5 = scmp.lt.s32.totalorder %s437_s30, %s437_s30 }
   0xc   :  { %p444_p6 = por %p443_p5, %p442_p4 }
   0xe   :  { %p445_p7 = pnand %p444_p6, %p438_p3 }
  0x10   :  { %448 = shalt.err (!%p445_p7)
}
  0x11   :  { %s522_s7 = smov 64   ;;  %s523_s8 = smov 4  }
  0x12   :  { %35 = dma.hbm_to_vmem [thread:$0]  %s636_s1, 256, %s30_s22, [#allocation5], %s522_s7, %s522_s7, %s523_s8  }
  0x13   :  { %s524_s11 = smov [#allocation2]   ;;  %s525_s13 = smov [#allocation6]  }
  0x14   :  { %s20_s12 = sshll.u32 %s524_s11, 4  ;;  %s41_s14 = sshll.u32 %s525_s13, 4  ;;  %s21_s12 = int_to_ptr.vmem [resolvable:$true] %s20_s12  ;;  %s42_s14 = int_to_ptr.vmem [resolvable:$true] %s41_s14 }
  0x15   :  { %s449_s17 = scalar_lea.hbm %s635_s0, 128 }
  0x16   :  { %p450_p8 = scmp.ne.s32.totalorder %s635_s0, %s449_s17  ;;  %p453_p9 = scmp.lt.u32.totalorder %s449_s17, %s635_s0 }
  0x18   :  { %p455_p10 = pnand %p453_p9, %p450_p8 }
  0x1a   :  { %458 = shalt.err (!%p455_p10)
}
  0x1b   :  { %s459_s1 = scalar_lea.vmem %s21_s12, 128  ;;  %p464_p12 = scmp.lt.s32.totalorder %s21_s12, %s21_s12 }
  0x1c   :  { %p460_p11 = scmp.ne.s32.totalorder %s21_s12, %s459_s1  ;;  %p465_p13 = scmp.lt.s32.totalorder %s459_s1, %s459_s1 }
  0x1e   :  { %p466_p0 = por %p465_p13, %p464_p12 }
  0x20   :  { %p467_p1 = pnand %p466_p0, %p460_p11 }
  0x22   :  { %470 = shalt.err (!%p467_p1)
}
  0x23   :  { %23 = dma.hbm_to_vmem [thread:$0]  %s635_s0, 128, %s21_s12, [#allocation3]  }
  0x24   :  { %s471_s26 = scalar_lea.hbm %s637_s2, 512 }
  0x25   :  { %p472_p2 = scmp.ne.s32.totalorder %s637_s2, %s471_s26  ;;  %p475_p3 = scmp.lt.u32.totalorder %s471_s26, %s637_s2 }
  0x27   :  { %p477_p4 = pnand %p475_p3, %p472_p2 }
  0x29   :  { %480 = shalt.err (!%p477_p4)
}
  0x2a   :  { %s481_s9 = scalar_lea.vmem %s42_s14, 512  ;;  %p486_p6 = scmp.lt.s32.totalorder %s42_s14, %s42_s14 }
  0x2b   :  { %p482_p5 = scmp.ne.s32.totalorder %s42_s14, %s481_s9  ;;  %p487_p7 = scmp.lt.s32.totalorder %s481_s9, %s481_s9 }
  0x2d   :  { %p488_p8 = por %p487_p7, %p486_p6 }
  0x2f   :  { %p489_p9 = pnand %p488_p8, %p482_p5 }
  0x31   :  { %492 = shalt.err (!%p489_p9)
}
  0x32   :  { %47 = dma.hbm_to_vmem [thread:$0]  %s637_s2, 512, %s42_s14, [#allocation5], %s522_s7, %s522_s7, %s523_s8  }
  0x33   :  { %s526_s11 = smov [#allocation7]   ;;  %s493_s16 = scalar_lea.hbm %s638_s3, 512 }
  0x34   :  { %s53_s12 = sshll.u32 %s526_s11, 4  ;;  %p494_p10 = scmp.ne.s32.totalorder %s638_s3, %s493_s16  ;;  %s54_s12 = int_to_ptr.vmem [resolvable:$true] %s53_s12 }
  0x35   :  { %p497_p11 = scmp.lt.u32.totalorder %s493_s16, %s638_s3 }
  0x37   :  { %p499_p12 = pnand %p497_p11, %p494_p10 }
  0x39   :  { %502 = shalt.err (!%p499_p12)
}
  0x3a   :  { %s503_s21 = scalar_lea.vmem %s54_s12, 512  ;;  %p508_p0 = scmp.lt.s32.totalorder %s54_s12, %s54_s12 }
  0x3b   :  { %p504_p13 = scmp.ne.s32.totalorder %s54_s12, %s503_s21  ;;  %p509_p1 = scmp.lt.s32.totalorder %s503_s21, %s503_s21 }
  0x3d   :  { %p510_p2 = por %p509_p1, %p508_p0 }
  0x3f   :  { %p511_p3 = pnand %p510_p2, %p504_p13 }
  0x41   :  { %514 = shalt.err (!%p511_p3)
}
  0x42   :  { %59 = dma.hbm_to_vmem [thread:$0]  %s638_s3, 512, %s54_s12, [#allocation8], %s522_s7, %s522_s7, %s523_s8  }
  0x43   :  { %515 = dma.done.wait [#allocation3], 128  }
  0x44   :  { %516 = vsyncadd [#allocation3], 4294967168 }
  0x45   :  { %517 = dma.done.wait [#allocation5], 768  }
  0x46   :  { %518 = vsyncadd [#allocation5], 4294966528 }
  0x47   :  { %519 = dma.done.wait [#allocation8], 512  }
  0x48   :  { %520 = vsyncadd [#allocation8], 4294966784  ;;  %v527_v0 = vmov 0.0   ;;  %vm528_vm0 = vmmov 0   ;;  %v411_v1 = vld [vmem:[#allocation4] sm:$0xff]   ;;  %v412_v2 = vld [vmem:[#allocation4 + $0x8] sm:$0xff]   ;;  %v84_v11 = vlaneseq }
  0x49   :  { %371 = vmatprep.subr.bf16.mxu0 %v527_v0  ;;  %375 = vmatprep.mubr.msk.bf16.mxu0 %vm528_vm0, %v527_v0  ;;  %v77_v3 = vld [vmem:[#allocation2] sm:$0xff]  ;;  %v413_v4 = vld [vmem:[#allocation6] sm:$0xff]   ;;  %vm100_vm1 = vcmask 261120   ;;  %v415_v7 = vld [vmem:[#allocation6 + $0x10] sm:$0xff]   ;;  %vm182_vm2 = vcmask 523264  }
  0x4a   :  { %379 = vmatprep.subr.bf16.mxu1 %v527_v0  ;;  %387 = vmatprep.mubr.msk.bf16.mxu1 %vm528_vm0, %v527_v0  ;;  %v414_v5 = vld [vmem:[#allocation6 + $0x8] sm:$0xff]   ;;  %v78_v6 = vpack.c.bf16 %v77_v3, %v77_v3  ;;  %v416_v8 = vld [vmem:[#allocation6 + $0x18] sm:$0xff]   ;;  %v417_v9 = vld [vmem:[#allocation7] sm:$0xff]   ;;  %v85_v12 = vshrl.u32 %v84_v11, 7  ;;  %v311_v51 = vand.u32 127, %v84_v11 }
  0x4b   :  { %372 = vmatpush3.bf16.msra.mxu0 %v411_v1  ;;  %380 = vmatpush3.bf16.msra.mxu1 %v413_v4  ;;  %v418_v10 = vld [vmem:[#allocation7 + $0x8] sm:$0xff]   ;;  %v419_v23 = vld [vmem:[#allocation7 + $0x10] sm:$0xff]   ;;  %v420_v24 = vld [vmem:[#allocation7 + $0x18] sm:$0xff]  }
  0x4c   :  { %373 = vmatprep.subr.bf16.mxu0 %v527_v0  ;;  %381 = vmatprep.subr.bf16.mxu1 %v527_v0  ;;  %v86_v13 = vsub.s32 0, %v85_v12  ;;  %v79_v14 = vld [vmem:[%s639_s4] sm:$0x3]  ;;  %v156_v25 = vsub.s32 1, %v85_v12  ;;  %vm333_vm5 = vcmp.lt.s32.totalorder %v311_v51, 8  ;;  %vm332_vm6 = vcmp.lt.s32.totalorder %v311_v51, 4 }
  0x4d   :  { %v352_v34 = vld [vmem:[%s640_s5] ss:$0 sm:$0xff] }
  0x4e   :  { %v87_v15 = vrot.slane %v79_v14, %v86_v13  ;;  %v157_v26 = vrot.slane %v79_v14, %v156_v25 }
  0x4f   :  { %374 = vmatpush3.bf16.msra.mxu0 %v412_v2  ;;  %382 = vmatpush3.bf16.msra.mxu1 %v414_v5 }
  0x50   :  { %391 = vmatprep.subr.bf16.mxu0 %v527_v0  ;;  %383 = vmatprep.subr.bf16.mxu1 %v527_v0 }
  0x52   :  { %376 = vmatmul.mubr.msk.bf16.vlgmr.msra.gmra.mrb[0].mxu0 %vm100_vm1, %v78_v6 }
  0x53   :  { %399 = vmatprep.mubr.msk.bf16.mxu0 %vm528_vm0, %v527_v0  ;;  %384 = vmatpush3.bf16.msra.mxu1 %v415_v7 }
  0x54   :  { %385 = vmatprep.subr.bf16.mxu1 %v527_v0  ;;  %392 = vmatpush3.bf16.msra.mxu0 %v417_v9 }
  0x55   :  { %393 = vmatprep.subr.bf16.mxu0 %v527_v0 }
  0x57   :  { %386 = vmatpush3.bf16.msra.mxu1 %v416_v8 }
  0x58   :  { %394 = vmatpush3.bf16.msra.mxu0 %v418_v10 }
  0x59   :  { %395 = vmatprep.subr.bf16.mxu0 %v527_v0 }
  0x5c   :  { %396 = vmatpush3.bf16.msra.mxu0 %v419_v23 }
  0x5d   :  { %397 = vmatprep.subr.bf16.mxu0 %v527_v0 }
  0x60   :  { %398 = vmatpush3.bf16.msra.mxu0 %v420_v24 }
 0x125   :  { %v138_v16 = vpop.f32.mrb[0].mxu0 }
 0x126   :  { %v139_v17 = vadd.f32 %v138_v16, %v87_v15  ;;  %v377_v18 = vpop.f32.mrb[1].mxu0 }
 0x127   :  { %v141_v19 = vpop.f32.mrb[2].mxu0 }
 0x128   :  { %v144_v20 = vmax.f32 %v139_v17, 0.0  ;;  %v378_v21 = vpop.f32.mrb[3].mxu0 }
 0x12a   :  { %v145_v22 = vpack.c.bf16 %v144_v20, %v144_v20 }
 0x12c   :  { %388 = vmatmul.mubr.msk.bf16.vlgmr.msra.gmra.mrb[0].mxu1 %vm182_vm2, %v145_v22 }
 0x1ff   :  { %v220_v27 = vpop.f32.mrb[0].mxu1 }
 0x200   :  { %v221_v28 = vadd.f32 %v220_v27, %v157_v26  ;;  %v389_v29 = vpop.f32.mrb[1].mxu1 }
 0x201   :  { %v223_v30 = vpop.f32.mrb[2].mxu1 }
 0x202   :  { %v226_v31 = vmax.f32 %v221_v28, 0.0  ;;  %v390_v32 = vpop.f32.mrb[3].mxu1 }
 0x204   :  { %v227_v33 = vpack.c.bf16 %v226_v31, %v226_v31 }
 0x206   :  { %400 = vmatmul.mubr.msk.bf16.vlgmr.msra.gmra.mrb[4].mxu0 %vm182_vm2, %v227_v33 }
 0x2d9   :  { %v304_v35 = vpop.f32.mrb[4].mxu0 }
 0x2da   :  { %v305_v36 = vadd.f32 %v352_v34, %v304_v35  ;;  %v401_v37 = vpop.f32.mrb[5].mxu0 }
 0x2db   :  { %v307_v38 = vpop.f32.mrb[6].mxu0 }
 0x2dc   :  { %v316_v39 = vand.u32 2147483647, %v305_v36  ;;  %v402_v40 = vpop.f32.mrb[7].mxu0  ;;  %v313_v52 = vmax.f32 %v305_v36, 0.0  ;;  %vm314_vm4 = vcmp.ne.f32.partialorder %v305_v36, %v305_v36 }
 0x2de   :  { %v317_v41 = vsub.f32 0.0, %v316_v39 }
 0x2e0   :  { %v318_v42 = vmul.f32 1.442695, %v317_v41 }
 0x2e2   :  { %421 = vpow2.f32 %v318_v42 }
 0x2ec   :  { %v422_v43 = vpop.eup %421 }
 0x2ed   :  { %v320_v44 = vadd.f32 1.0, %v422_v43  ;;  %v323_v45 = vmul.f32 -0.5, %v422_v43  ;;  %v326_v47 = vand.u32 2147483647, %v422_v43 }
 0x2ef   :  { %423 = vlog2.f32 %v320_v44  ;;  %v324_v46 = vadd.f32 1.0, %v323_v45  ;;  %vm327_vm3 = vcmp.lt.f32.partialorder %v326_v47, 0.0004427343 }
 0x2f0   :  { %425 = vtanh.f32 %v305_v36 }
 0x2f1   :  { %v325_v50 = vmul.f32 %v422_v43, %v324_v46 }
 0x2f9   :  { %v424_v48 = vpop.eup %423 }
 0x2fa   :  { %v322_v49 = vmul.f32 0.6931472, %v424_v48  ;;  %v426_v57 = vpop.eup %425 }
 0x2fc   :  { %v328_v53 = vsel %vm327_vm3, %v325_v50, %v322_v49 }
 0x2fd   :  { %v329_v54 = vadd.f32 %v328_v53, %v313_v52 }
 0x2ff   :  { %v330_v55 = vsel %vm314_vm4, %v305_v36, %v329_v54 }
 0x300   :  { %v331_v56 = vmax.f32 %v330_v55, 1e-10 }
 0x302   :  { %v334_v58 = vsel %vm333_vm5, %v331_v56, %v305_v36 }
 0x303   :  { %v335_v59 = vsel %vm332_vm6, %v426_v57, %v334_v58 }
 0x304   :  { %336 = vst [vmem:[%s641_s6] sm:$0xff] %v335_v59 }
 0x305   :  { %341 = vsyncpa [#allocation3], 1 }
 0x306   :  { %342 = vsyncpa [#allocation5], 1 }
 0x307   :  { %343 = vsyncpa [#allocation8], 1 }

</bundles_post_ra>
